<compile_context>
chip_gen: v7x
topology: tpu7x:2x2x1
jax: 0.10.0
libtpu: 0.0.40
codegen_flags: <defaults>
</compile_context>

<pallas_src>
import math
import functools

import jax
import jax.numpy as jnp
from jax.experimental import pallas as pl
from jax.experimental.pallas import tpu as pltpu


# ----------------------------- kernels -----------------------------

def _fused_gcn_kernel(adj_ref, x_ref, w_ref, b_ref, o_ref, acc_ref):
    """acc[i] += adj[i, k_tile] @ (x[k_tile] @ w); finalize adds bias."""
    k = pl.program_id(1)

    @pl.when(k == 0)
    def _():
        acc_ref[...] = jnp.zeros_like(acc_ref)

    a_tile = adj_ref[...]
    # Support tile recomputed on the fly (weight is VMEM-resident). The x
    # re-read (F_in wide) is cheaper than a support re-read (F_out_p wide)
    # whenever F_in <= F_out_p, and the extra MXU work is hidden under the
    # adjacency HBM stream.
    sup = jnp.dot(x_ref[...], w_ref[...], preferred_element_type=jnp.float32)
    acc_ref[...] += jnp.dot(a_tile, sup.astype(a_tile.dtype),
                            preferred_element_type=jnp.float32)

    @pl.when(k == pl.num_programs(1) - 1)
    def _():
        o_ref[...] = (acc_ref[...] + b_ref[...]).astype(o_ref.dtype)


def _support_kernel(x_ref, w_ref, s_ref):
    # support_tile = x_tile @ w   (MXU, f32 accumulation)
    s_ref[...] = jnp.dot(
        x_ref[...], w_ref[...], preferred_element_type=jnp.float32
    ).astype(s_ref.dtype)


def _aggregate_kernel(tk, resident, adj_ref, sup_ref, b_ref, o_ref, acc_ref):
    """out_tile = sum_k adj[i, k_tile] @ support[k_tile] + bias.

    If `resident`, sup_ref holds the FULL (N, F_out_p) support matrix in VMEM
    (DMA'd once via a constant index_map) and we slice the k-tile out of it;
    otherwise sup_ref is already the (tk, F_out_p) streamed tile.
    """
    k = pl.program_id(1)

    @pl.when(k == 0)
    def _():
        acc_ref[...] = jnp.zeros_like(acc_ref)

    if resident:
        off = pl.multiple_of(k * tk, tk)
        sup = sup_ref[pl.ds(off, tk), :]
    else:
        sup = sup_ref[...]

    acc_ref[...] += jnp.dot(adj_ref[...], sup,
                            preferred_element_type=jnp.float32)

    @pl.when(k == pl.num_programs(1) - 1)
    def _():
        o_ref[...] = (acc_ref[...] + b_ref[...]).astype(o_ref.dtype)


# ----------------------------- helpers -----------------------------

def _round_up(x, m):
    return ((x + m - 1) // m) * m


def _pick_tile(dim, target, align):
    """Largest multiple of `align` that divides `dim` and is <= target, else dim."""
    if dim <= align:
        return dim
    target = min(max(target, align), dim)
    t = (target // align) * align
    while t >= align:
        if dim % t == 0:
            return t
        t -= align
    return dim


def _vmem_cap_bytes():
    """Generation-aware ceiling for vmem_limit_bytes."""
    try:
        phys = int(pltpu.get_tpu_info().vmem_capacity_bytes)
    except Exception:
        phys = 64 << 20
    # v5e/v6e have 128 MiB physical VMEM -> allow ~96 MiB; v7x has 64 MiB ->
    # stay <= 48 MiB.
    return (96 << 20) if phys >= (100 << 20) else (48 << 20)


def _vmem_limit_bytes(pipeline_bytes, scratch_bytes, cap):
    est = 2 * pipeline_bytes + scratch_bytes      # double-buffered pipeline
    est = int(est * 1.5) + (2 << 20)              # headroom
    # >= 32 MiB (v5e default scoped limit is only 16 MiB), <= generation cap.
    return int(min(max(est, 32 << 20), cap))


# ----------------------------- wrapper -----------------------------

@functools.partial(jax.jit,
                   static_argnames=("tile_n", "tile_k", "use_bf16", "fuse"))
def graph_convolution(x, adj, w, b=None, *, tile_n=None, tile_k=None,
                      use_bf16=False, fuse=None):
    """out = adj @ (x @ w) + b   (GraphConvolution.forward)."""
    N, f_in = x.shape
    f_out = w.shape[1]
    assert adj.shape == (N, N)

    out_dtype = x.dtype
    # Lane-dense output: pad F_out up to a multiple of 128 (sliced off at end).
    f_out_p = _round_up(f_out, 128)

    # Streaming dtype: bf16 halves the HBM bytes of the N^2 adjacency.
    # NOTE: only cast when needed -- callers should cast adj to bf16 ONCE and
    # pass it in so the cast round-trip is amortized across layers/steps.
    cdt = jnp.bfloat16 if use_bf16 else x.dtype
    x_c = x if x.dtype == cdt else x.astype(cdt)
    adj_c = adj if adj.dtype == cdt else adj.astype(cdt)
    w_c = w if w.dtype == cdt else w.astype(cdt)

    if f_out_p != f_out:
        w_c = jnp.pad(w_c, ((0, 0), (0, f_out_p - f_out)))

    if b is None:
        b2 = jnp.zeros((1, f_out_p), jnp.float32)
    else:
        b2 = jnp.reshape(b, (1, f_out)).astype(jnp.float32)
        if f_out_p != f_out:
            b2 = jnp.pad(b2, ((0, 0), (0, f_out_p - f_out)))

    isz = jnp.dtype(cdt).itemsize
    osz = jnp.dtype(out_dtype).itemsize
    sub_align = 16 if isz < 4 else 8          # bf16 packs 2 rows per sublane
    vmem_cap = _vmem_cap_bytes()

    # ---- tile selection -------------------------------------------------
    # Large tiles amortize the ~0.35 us/step grid overhead; cap the row
    # ("parallel") tile at N//2 so it still splits across v7x's two TCs.
    row_target = 512
    if N >= 2 * sub_align:
        row_target = min(row_target, max(sub_align, N // 2))
    tn = tile_n if tile_n is not None else _pick_tile(N, row_target, sub_align)
    tk = tile_k if tile_k is not None else _pick_tile(N, 2048, 128)
    assert N % tn == 0 and (tn == N or tn % sub_align == 0), \
        "tile_n must divide N and be sublane-aligned (16 for bf16, 8 for f32)"
    assert N % tk == 0 and (tk == N or tk % 128 == 0), \
        "tile_k must divide N and be 128-aligned"

    if fuse is None:
        # Fuse x @ w into the aggregation whenever the resident weight is
        # small; beyond that the two-pass path is used.
        fuse = (f_in <= 1024) and (f_in * f_out_p * isz <= (8 << 20))

    if fuse:
        # ---------------- fused single-kernel path ----------------
        pipeline_bytes = (tn * tk * isz             # adj tile
                          + tk * f_in * isz         # x k-tile
                          + f_in * f_out_p * isz    # resident weight
                          + f_out_p * 4             # bias
                          + tn * f_out_p * osz)     # out tile
        vmem = _vmem_limit_bytes(pipeline_bytes, tn * f_out_p * 4, vmem_cap)
        out_p = pl.pallas_call(
            _fused_gcn_kernel,
            out_shape=jax.ShapeDtypeStruct((N, f_out_p), out_dtype),
            grid_spec=pltpu.PrefetchScalarGridSpec(
                num_scalar_prefetch=0,
                grid=(N // tn, N // tk),
                in_specs=[
                    pl.BlockSpec((tn, tk), lambda i, k: (i, k)),         # adj
                    pl.BlockSpec((tk, f_in), lambda i, k: (k, 0)),       # x
                    pl.BlockSpec((f_in, f_out_p), lambda i, k: (0, 0)),  # w (resident)
                    pl.BlockSpec((1, f_out_p), lambda i, k: (0, 0)),     # bias
                ],
                out_specs=pl.BlockSpec((tn, f_out_p), lambda i, k: (i, 0)),
                scratch_shapes=[pltpu.VMEM((tn, f_out_p), jnp.float32)],
            ),
            compiler_params=pltpu.CompilerParams(
                dimension_semantics=("parallel", "arbitrary"),
                vmem_limit_bytes=vmem,
            ),
            cost_estimate=pl.CostEstimate(
                flops=2 * N * N * f_out_p + 2 * (N // tn) * N * f_in * f_out_p,
                transcendentals=0,
                bytes_accessed=N * N * isz
                + (N // tn) * N * f_in * isz
                + N * f_out_p * osz,
            ),
        )(adj_c, x_c, w_c, b2)

        if f_out_p != f_out:
            out_p = out_p[:, :f_out]
        return out_p

    # ---------------- two-pass fallback path (large F_in) ----------------
    # Support intermediate stored in bf16 (internal only): halves its HBM
    # write + re-read stream; accumulation stays f32 on the MXU.
    sdt = jnp.bfloat16
    ssz = 2

    # Kernel A: large decoupled row tile, capped by a VMEM budget.
    w_bytes = f_in * f_out_p * isz
    per_row = f_in * isz + f_out_p * ssz
    budget = vmem_cap // 3
    max_rows = max(16, (budget // 2 - w_bytes) // max(per_row, 1))
    ta = _pick_tile(N, min(2048, int(max_rows)), 16)

    vmem_a = _vmem_limit_bytes(
        ta * f_in * isz + w_bytes + ta * f_out_p * ssz, 0, vmem_cap)
    support = pl.pallas_call(
        _support_kernel,
        out_shape=jax.ShapeDtypeStruct((N, f_out_p), sdt),
        grid_spec=pltpu.PrefetchScalarGridSpec(
            num_scalar_prefetch=0,
            grid=(N // ta,),
            in_specs=[
                pl.BlockSpec((ta, f_in), lambda i: (i, 0)),
                pl.BlockSpec((f_in, f_out_p), lambda i: (0, 0)),
            ],
            out_specs=pl.BlockSpec((ta, f_out_p), lambda i: (i, 0)),
        ),
        compiler_params=pltpu.CompilerParams(
            dimension_semantics=("parallel",),
            vmem_limit_bytes=vmem_a,
        ),
        cost_estimate=pl.CostEstimate(
            flops=2 * N * f_in * f_out_p,
            transcendentals=0,
            bytes_accessed=N * f_in * isz + w_bytes + N * f_out_p * ssz,
        ),
    )(x_c, w_c)

    # Kernel B: keep the whole support matrix VMEM-resident when it fits
    # (DMA'd once; no per-row-tile re-read), else stream k-tiles.
    resident = (N * f_out_p * ssz) <= (vmem_cap // 3)
    if resident:
        sup_spec = pl.BlockSpec((N, f_out_p), lambda i, k: (0, 0))
        sup_bytes = N * f_out_p * ssz
    else:
        sup_spec = pl.BlockSpec((tk, f_out_p), lambda i, k: (k, 0))
        sup_bytes = tk * f_out_p * ssz

    vmem_b = _vmem_limit_bytes(
        tn * tk * isz + sup_bytes + f_out_p * 4 + tn * f_out_p * osz,
        tn * f_out_p * 4, vmem_cap)
    out_p = pl.pallas_call(
        functools.partial(_aggregate_kernel, tk, resident),
        out_shape=jax.ShapeDtypeStruct((N, f_out_p), out_dtype),
        grid_spec=pltpu.PrefetchScalarGridSpec(
            num_scalar_prefetch=0,
            grid=(N // tn, N // tk),
            in_specs=[
                pl.BlockSpec((tn, tk), lambda i, k: (i, k)),    # adj tile
                sup_spec,                                        # support
                pl.BlockSpec((1, f_out_p), lambda i, k: (0, 0)),  # bias
            ],
            out_specs=pl.BlockSpec((tn, f_out_p), lambda i, k: (i, 0)),
            scratch_shapes=[pltpu.VMEM((tn, f_out_p), jnp.float32)],
        ),
        compiler_params=pltpu.CompilerParams(
            dimension_semantics=("parallel", "arbitrary"),
            vmem_limit_bytes=vmem_b,
        ),
        cost_estimate=pl.CostEstimate(
            flops=2 * N * N * f_out_p,
            transcendentals=0,
            bytes_accessed=N * N * isz
            + (N * f_out_p * ssz if resident
               else (N // tn) * N * f_out_p * ssz)
            + N * f_out_p * osz,
        ),
    )(adj_c, support, b2)

    if f_out_p != f_out:
        out_p = out_p[:, :f_out]
    return out_p


def init_gcn_params(key, in_features, out_features, bias=True):
    """Deterministic re-implementation of GraphConvolution.reset_parameters."""
    stdv = 1.0 / math.sqrt(out_features)
    kw, kb = jax.random.split(key)
    w = jax.random.uniform(kw, (in_features, out_features),
                           minval=-stdv, maxval=stdv, dtype=jnp.float32)
    if bias:
        b = jax.random.uniform(kb, (1, out_features),
                               minval=-stdv, maxval=stdv, dtype=jnp.float32)
    else:
        b = None
    return w, b


if __name__ == "__main__":
    key = jax.random.PRNGKey(0)
    k_x, k_adj, k_p = jax.random.split(key, 3)

    N = 256        # number of graph nodes
    F_IN = 64      # in_features
    F_OUT = 96     # out_features (not a 128 multiple -> exercises lane padding)

    x = jax.random.normal(k_x, (N, F_IN), dtype=jnp.float32)
    # symmetric, row-normalized adjacency (deterministic)
    a = jax.random.uniform(k_adj, (N, N), dtype=jnp.float32)
    adj = (a + a.T) * 0.5
    adj = adj / jnp.sum(adj, axis=1, keepdims=True)

    w, b = init_gcn_params(k_p, F_IN, F_OUT, bias=True)

    # high-precision f32 reference
    hp = jax.lax.Precision.HIGHEST
    ref = jnp.dot(adj, jnp.dot(x, w, precision=hp), precision=hp) + b

    # 1) fused f32 path, auto tiles (tn=128 -> 2 parallel row tiles for v7x)
    out = jax.block_until_ready(graph_convolution(x, adj, w, b))
    assert out.shape == (N, F_OUT)
    assert jnp.allclose(out, ref, atol=1e-4, rtol=1e-4), "fused f32 mismatch"

    # 2) fused f32 path, explicit small tiles -> multi-step k reduction
    out2 = jax.block_until_ready(
        graph_convolution(x, adj, w, b, tile_n=64, tile_k=128))
    assert jnp.allclose(out2, ref, atol=1e-4, rtol=1e-4), "fused tiled mismatch"

    # 3) two-pass fallback (support kernel + VMEM-resident aggregation);
    #    support intermediate is bf16, hence the looser tolerance
    out3 = jax.block_until_ready(graph_convolution(x, adj, w, b, fuse=False))
    assert jnp.allclose(out3, ref, atol=1e-2, rtol=1e-2), "two-pass mismatch"

    # 4) bf16 adjacency streaming: adj cast ONCE outside (amortized), f32 acc
    adj_bf16 = adj.astype(jnp.bfloat16)
    out4 = jax.block_until_ready(
        graph_convolution(x, adj_bf16, w, b, use_bf16=True))
    assert jnp.allclose(out4, ref, atol=5e-2, rtol=5e-2), "bf16 mismatch"

    print("KERNEL_OK")
</pallas_src>

<mosaic_0001>
module attributes {stable_mosaic.version = 11 : i64} {
  func.func @_fused_gcn_kernel(%arg0: i32, %arg1: i32, %arg2: memref<128x256xf32, #tpu.memory_space<vmem>>, %arg3: memref<256x64xf32, #tpu.memory_space<vmem>>, %arg4: memref<64x128xf32, #tpu.memory_space<vmem>>, %arg5: memref<1x128xf32, #tpu.memory_space<vmem>>, %arg6: memref<128x128xf32, #tpu.memory_space<vmem>>, %arg7: memref<128x128xf32, #tpu.memory_space<vmem>>) attributes {dimension_semantics = [#tpu.dimension_semantics<parallel>, #tpu.dimension_semantics<arbitrary>], iteration_bounds = array<i64: 2, 1>, scalar_prefetch = 0 : i64, scratch_operands = 1 : i64, tpu.core_type = #tpu.core_type<tc>, window_params = [{transform_indices = @transform_0, window_bounds = array<i64: 128, 256>}, {transform_indices = @transform_1, window_bounds = array<i64: 256, 64>}, {pipeline_mode = #tpu.pipeline_mode<synchronous>, transform_indices = @transform_2, window_bounds = array<i64: 64, 128>}, {pipeline_mode = #tpu.pipeline_mode<synchronous>, transform_indices = @transform_3, window_bounds = array<i64: 1, 128>}, {transform_indices = @transform_4, window_bounds = array<i64: 128, 128>}]} {
    %c0_i32 = arith.constant 0 : i32
    %0 = arith.cmpi eq, %arg1, %c0_i32 : i32
    %1 = arith.extui %0 : i1 to i32
    %c0_i32_0 = arith.constant 0 : i32
    %2 = arith.cmpi ne, %1, %c0_i32_0 : i32
    scf.if %2 {
      %cst_13 = arith.constant 0.000000e+00 : f32
      %14 = vector.broadcast %cst_13 : f32 to vector<128x128xf32>
      %c0_14 = arith.constant 0 : index
      %c0_15 = arith.constant 0 : index
      %15 = vector.load %arg7[%c0_14, %c0_15] : memref<128x128xf32, #tpu.memory_space<vmem>>, vector<128x128xf32>
      tpu.vector_store %arg7[%c0_14, %c0_15], %14 {strides = array<i32>} : memref<128x128xf32, #tpu.memory_space<vmem>>, vector<128x128xf32>,
    } else {
    }
    %c0 = arith.constant 0 : index
    %c0_1 = arith.constant 0 : index
    %3 = vector.load %arg2[%c0, %c0_1] : memref<128x256xf32, #tpu.memory_space<vmem>>, vector<128x256xf32>
    %c0_2 = arith.constant 0 : index
    %c0_3 = arith.constant 0 : index
    %4 = vector.load %arg3[%c0_2, %c0_3] : memref<256x64xf32, #tpu.memory_space<vmem>>, vector<256x64xf32>
    %c0_4 = arith.constant 0 : index
    %c0_5 = arith.constant 0 : index
    %5 = vector.load %arg4[%c0_4, %c0_5] : memref<64x128xf32, #tpu.memory_space<vmem>>, vector<64x128xf32>
    %cst = arith.constant dense<0.000000e+00> : vector<256x128xf32>
    %6 = tpu.matmul %4, %5, %cst {dimension_numbers = #tpu.dot_dimension_numbers<[1], [0], [0], [1], [0, 0, 1, 1], [], []>} : vector<256x64xf32>, vector<64x128xf32>, vector<256x128xf32> -> vector<256x128xf32>
    %c0_6 = arith.constant 0 : index
    %c0_7 = arith.constant 0 : index
    %7 = vector.load %arg7[%c0_6, %c0_7] : memref<128x128xf32, #tpu.memory_space<vmem>>, vector<128x128xf32>
    %cst_8 = arith.constant dense<0.000000e+00> : vector<128x128xf32>
    %8 = tpu.matmul %3, %6, %cst_8 {dimension_numbers = #tpu.dot_dimension_numbers<[1], [0], [0], [1], [0, 0, 1, 1], [], []>} : vector<128x256xf32>, vector<256x128xf32>, vector<128x128xf32> -> vector<128x128xf32>
    %9 = arith.addf %7, %8 : vector<128x128xf32>
    %c0_9 = arith.constant 0 : index
    %c0_10 = arith.constant 0 : index
    %10 = vector.load %arg7[%c0_9, %c0_10] : memref<128x128xf32, #tpu.memory_space<vmem>>, vector<128x128xf32>
    tpu.vector_store %arg7[%c0_9, %c0_10], %9 {strides = array<i32>} : memref<128x128xf32, #tpu.memory_space<vmem>>, vector<128x128xf32>,
    %c0_i32_11 = arith.constant 0 : i32
    %11 = arith.cmpi eq, %arg1, %c0_i32_11 : i32
    %12 = arith.extui %11 : i1 to i32
    %c0_i32_12 = arith.constant 0 : i32
    %13 = arith.cmpi ne, %12, %c0_i32_12 : i32
    scf.if %13 {
      %c0_13 = arith.constant 0 : index
      %c0_14 = arith.constant 0 : index
      %14 = vector.load %arg7[%c0_13, %c0_14] : memref<128x128xf32, #tpu.memory_space<vmem>>, vector<128x128xf32>
      %c0_15 = arith.constant 0 : index
      %c0_16 = arith.constant 0 : index
      %15 = vector.load %arg5[%c0_15, %c0_16] : memref<1x128xf32, #tpu.memory_space<vmem>>, vector<1x128xf32>
      %16 = vector.broadcast %15 : vector<1x128xf32> to vector<128x128xf32>
      %17 = arith.addf %14, %16 : vector<128x128xf32>
      %c0_17 = arith.constant 0 : index
      %c0_18 = arith.constant 0 : index
      %18 = vector.load %arg6[%c0_17, %c0_18] : memref<128x128xf32, #tpu.memory_space<vmem>>, vector<128x128xf32>
      tpu.vector_store %arg6[%c0_17, %c0_18], %17 {strides = array<i32>} : memref<128x128xf32, #tpu.memory_space<vmem>>, vector<128x128xf32>,
    } else {
    }
    return
  }
  func.func @transform_0(%arg0: i32, %arg1: i32) -> (i32, i32) {
    %c0_i32 = arith.constant 0 : i32
    return %arg0, %arg1 : i32, i32
  }
  func.func @transform_1(%arg0: i32, %arg1: i32) -> (i32, i32) {
    %c0_i32 = arith.constant 0 : i32
    %c0_i32_0 = arith.constant 0 : i32
    return %arg1, %c0_i32 : i32, i32
  }
  func.func @transform_2(%arg0: i32, %arg1: i32) -> (i32, i32) {
    %c0_i32 = arith.constant 0 : i32
    %c0_i32_0 = arith.constant 0 : i32
    %c0_i32_1 = arith.constant 0 : i32
    return %c0_i32, %c0_i32_0 : i32, i32
  }
  func.func @transform_3(%arg0: i32, %arg1: i32) -> (i32, i32) {
    %c0_i32 = arith.constant 0 : i32
    %c0_i32_0 = arith.constant 0 : i32
    %c0_i32_1 = arith.constant 0 : i32
    return %c0_i32, %c0_i32_0 : i32, i32
  }
  func.func @transform_4(%arg0: i32, %arg1: i32) -> (i32, i32) {
    %c0_i32 = arith.constant 0 : i32
    %c0_i32_0 = arith.constant 0 : i32
    return %arg0, %c0_i32 : i32, i32
  }
}

</mosaic_0001>

<bundles_post_ra>
// kernel: graph_convolution.1
= control target key start
LH: loop header
LB: loop body
LE: loop exit
PB: predicated region body
PF: predicated region fallthrough
CT: control target
= control target key end

     0   :  { %s1373_s15 = smov 0   ;;  %s1375_s16 = smov 0   ;;  %s1638_s0 = inlined_call_operand.vmem [shape: f32[256,256], index: 0, kind: input, shape index: {}]   ;;  %s1639_s1 = inlined_call_operand.vmem [shape: f32[256,64], index: 1, kind: input, shape index: {}]   ;;  %s1640_s2 = inlined_call_operand.vmem [shape: f32[64,128], index: 2, kind: input, shape index: {}]   ;;  %s1641_s3 = inlined_call_operand.vmem [shape: f32[1,128], index: 3, kind: input, shape index: {}]   ;;  %s1642_s4 = inlined_call_operand.vmem [shape: f32[256,128], index: 4, kind: output, shape index: {}]  }
   0x1   :  { %s1377_s17 = smov 0  }
   0x2 LB: > { %s26_s18 = sadd.s32 1, %s1342_s16  ;;  %p1010_p0 = scmp.ge.s32.totalorder %s1346_s17, 1  ;;  %s1346_s17 = sphi %s1377_s17, %s14_s17   ;;  %s1342_s16 = sphi %s1375_s16, %s1644_s16   ;;  %s1338_s15 = sphi %s1373_s15, %s1643_s15  }
   0x3   : > { %p28_p1 = scmp.ge.s32.totalorder %s26_s18, 2  ;;  %p194_p2 = scmp.lt.s32.totalorder %s1346_s17, 3 }
   0x5   : > { %s1646_s18 = smov (%p28_p1, %s26_s18), 0  ;;  %p195_p3 = pnand %p1010_p0, %p194_p2 }
   0x6   : > { %v338_v0 = vld [vmem:[%s1640_s2] sm:$0xff] (!%p195_p3)  ;;  %v339_v1 = vld [vmem:[%s1640_s2 + $0x8] sm:$0xff] (!%p195_p3)  ;;  %v340_v2 = vld [vmem:[%s1640_s2 + $0x10] sm:$0xff] (!%p195_p3)  ;;  %vm346_vm0 = vcmask (!%p195_p3), 523264   ;;  %s1011_s7 = sshll.u32 (!%p195_p3), %s1338_s15, 4 }
   0x7   : > { %198 = sbr.rel (%p195_p3) target bundleno = 574 (0x23e), region = 36  ;;  %v1236_v3 = vpack.c.bf16 (!%p195_p3), %v339_v1, %v338_v0  ;;  %v341_v4 = vld [vmem:[%s1640_s2 + $0x18] sm:$0xff] (!%p195_p3)  ;;  %v342_v6 = vld [vmem:[%s1640_s2 + $0x20] sm:$0xff] (!%p195_p3)  ;;  %v343_v7 = vld [vmem:[%s1640_s2 + $0x28] sm:$0xff] (!%p195_p3)  ;;  %p232_p4 = scmp.lt.s32.totalorder (!%p195_p3), %s1011_s7, 31 }
   0x8   : > { %v1240_v5 = vpack.c.bf16 (!%p195_p3), %v341_v4, %v340_v2  ;;  %v306_v8 = vld [vmem:[%s1639_s1] sm:$0xff] (!%p195_p3)  ;;  %v1244_v9 = vpack.c.bf16 (!%p195_p3), %v343_v7, %v342_v6  ;;  %v344_v10 = vld [vmem:[%s1640_s2 + $0x30] sm:$0xff] (!%p195_p3)  ;;  %v345_v11 = vld [vmem:[%s1640_s2 + $0x38] sm:$0xff] (!%p195_p3) }
   0x9   : > { %1237 = vmatprep.subr.bf16.mxu0 (!%p195_p3), %v1236_v3  ;;  %1188 = vmatprep.mubr.msk.f32.mxu0 (!%p195_p3), %vm346_vm0, %v306_v8  ;;  %v1248_v12 = vpack.c.bf16 (!%p195_p3), %v345_v11, %v344_v10  ;;  %v307_v13 = vld [vmem:[%s1639_s1 + $0x8] sm:$0xff] (!%p195_p3)  ;;  %v308_v14 = vld [vmem:[%s1639_s1 + $0x10] sm:$0xff] (!%p195_p3)  ;;  %v309_v15 = vld [vmem:[%s1639_s1 + $0x18] sm:$0xff] (!%p195_p3) }
   0xa   : > { %1239 = vmatpush3.bf16.msra.mxu0 (!%p195_p3), %v1236_v3  ;;  %v310_v16 = vld [vmem:[%s1639_s1 + $0x20] sm:$0xff] (!%p195_p3)  ;;  %v311_v17 = vld [vmem:[%s1639_s1 + $0x28] sm:$0xff] (!%p195_p3)  ;;  %v312_v18 = vld [vmem:[%s1639_s1 + $0x30] sm:$0xff] (!%p195_p3) }
   0xb   : > { %1241 = vmatprep.subr.bf16.mxu0 (!%p195_p3), %v1240_v5  ;;  %v313_v19 = vld [vmem:[%s1639_s1 + $0x38] sm:$0xff] (!%p195_p3)  ;;  %v314_v20 = vld [vmem:[%s1639_s1 + $0x40] sm:$0xff] (!%p195_p3)  ;;  %v315_v21 = vld [vmem:[%s1639_s1 + $0x48] sm:$0xff] (!%p195_p3) }
   0xc   : > { %v316_v22 = vld [vmem:[%s1639_s1 + $0x50] sm:$0xff] (!%p195_p3)  ;;  %v317_v23 = vld [vmem:[%s1639_s1 + $0x58] sm:$0xff] (!%p195_p3)  ;;  %v318_v24 = vld [vmem:[%s1639_s1 + $0x60] sm:$0xff] (!%p195_p3) }
   0xd   : > { %v319_v25 = vld [vmem:[%s1639_s1 + $0x68] sm:$0xff] (!%p195_p3)  ;;  %v320_v26 = vld [vmem:[%s1639_s1 + $0x70] sm:$0xff] (!%p195_p3)  ;;  %v321_v27 = vld [vmem:[%s1639_s1 + $0x78] sm:$0xff] (!%p195_p3) }
   0xe   : > { %1243 = vmatpush3.bf16.msra.mxu0 %v1240_v5  ;;  %v322_v28 = vld [vmem:[%s1639_s1 + $0x80] sm:$0xff]  ;;  %v323_v29 = vld [vmem:[%s1639_s1 + $0x88] sm:$0xff]  ;;  %v324_v30 = vld [vmem:[%s1639_s1 + $0x90] sm:$0xff]  ;;  %s1648_s7 = smov (!%p232_p4, %s1011_s7), 31 }
   0xf   : > { %1245 = vmatprep.subr.bf16.mxu0 %v1244_v9  ;;  %v325_v31 = vld [vmem:[%s1639_s1 + $0x98] sm:$0xff]  ;;  %v326_v32 = vld [vmem:[%s1639_s1 + $0xa0] sm:$0xff]  ;;  %v327_v33 = vld [vmem:[%s1639_s1 + $0xa8] sm:$0xff]  ;;  %s1051_s8 = sshll.u32 %s1648_s7, 4  ;;  %s1015_s15 = sshll.u32 %s1648_s7, 3 }
  0x10   : > { %v328_v34 = vld [vmem:[%s1639_s1 + $0xb0] sm:$0xff]  ;;  %v329_v35 = vld [vmem:[%s1639_s1 + $0xb8] sm:$0xff]  ;;  %v330_v36 = vld [vmem:[%s1639_s1 + $0xc0] sm:$0xff]  ;;  %s1552_s11 = scalar_lea.vmem %s1638_s0, %s1051_s8  ;;  %s1595_s20 = scalar_lea.vmem %s1642_s4, %s1015_s15 }
  0x11   : > { %v331_v37 = vld [vmem:[%s1639_s1 + $0xc8] sm:$0xff]  ;;  %v332_v38 = vld [vmem:[%s1639_s1 + $0xd0] sm:$0xff]  ;;  %v333_v39 = vld [vmem:[%s1639_s1 + $0xd8] sm:$0xff] }
  0x12   : > { %1247 = vmatpush3.bf16.msra.mxu0 %v1244_v9  ;;  %v334_v40 = vld [vmem:[%s1639_s1 + $0xe0] sm:$0xff]  ;;  %v335_v41 = vld [vmem:[%s1639_s1 + $0xe8] sm:$0xff]  ;;  %v336_v42 = vld [vmem:[%s1639_s1 + $0xf0] sm:$0xff] }
  0x13   : > { %1249 = vmatprep.subr.bf16.mxu0 %v1248_v12  ;;  %v337_v43 = vld [vmem:[%s1639_s1 + $0xf8] sm:$0xff]  ;;  %v279_v44 = vld [vmem:[%s1552_s11 + $0x28] sm:$0xff] }
  0x14   : > { %758 = vmatprep.mubr.f32.mxu1 %v279_v44  ;;  %v275_v45 = vld [vmem:[%s1552_s11 + $0x8] sm:$0xff] }
  0x15   : > { %v291_v44 = vld [vmem:[%s1552_s11 + $0x88] sm:$0xff] }
  0x16   : > { %1251 = vmatpush3.bf16.msra.mxu0 %v1248_v12 }
  0x19   : > { %1189 = vmatmul.mubr.msk.f32.vlgmr.msra.gmra.mrb[0].mxu0 %vm346_vm0, %v307_v13 }
  0x1a   : > { %1191 = vmatprep.mubr.msk.f32.mxu0 %vm346_vm0, %v308_v14 }
  0x1d   : > { %1192 = vmatmul.mubr.msk.f32.gmra.mrb[2].mxu0 %vm346_vm0, %v309_v15 }
  0x1e   : > { %1194 = vmatprep.mubr.msk.f32.mxu0 %vm346_vm0, %v310_v16 }
  0x21   : > { %1195 = vmatmul.mubr.msk.f32.gmra.mrb[4].mxu0 %vm346_vm0, %v311_v17 }
  0x22   : > { %1197 = vmatprep.mubr.msk.f32.mxu0 %vm346_vm0, %v312_v18 }
  0x25   : > { %1198 = vmatmul.mubr.msk.f32.gmra.mrb[6].mxu0 %vm346_vm0, %v313_v19 }
  0x26   : > { %1200 = vmatprep.mubr.msk.f32.mxu0 %vm346_vm0, %v314_v20 }
  0x29   : > { %1201 = vmatmul.mubr.msk.f32.gmra.mrb[8].mxu0 %vm346_vm0, %v315_v21 }
  0x2a   : > { %1203 = vmatprep.mubr.msk.f32.mxu0 %vm346_vm0, %v316_v22 }
  0x2d   : > { %1204 = vmatmul.mubr.msk.f32.gmra.mrb[10].mxu0 %vm346_vm0, %v317_v23 }
  0x2e   : > { %1206 = vmatprep.mubr.msk.f32.mxu0 %vm346_vm0, %v318_v24 }
  0x31   : > { %1207 = vmatmul.mubr.msk.f32.gmra.mrb[12].mxu0 %vm346_vm0, %v319_v25 }
  0x32   : > { %1209 = vmatprep.mubr.msk.f32.mxu0 %vm346_vm0, %v320_v26 }
  0x35   : > { %1210 = vmatmul.mubr.msk.f32.gmra.mrb[14].mxu0 %vm346_vm0, %v321_v27 }
  0x36   : > { %1212 = vmatprep.mubr.msk.f32.mxu0 %vm346_vm0, %v322_v28 }
  0x39   : > { %1213 = vmatmul.mubr.msk.f32.gmra.mrb[16].mxu0 %vm346_vm0, %v323_v29 }
  0x3a   : > { %1215 = vmatprep.mubr.msk.f32.mxu0 %vm346_vm0, %v324_v30  ;;  %v278_v30 = vld [vmem:[%s1552_s11 + $0x20] sm:$0xff] }
  0x3d   : > { %1216 = vmatmul.mubr.msk.f32.gmra.mrb[18].mxu0 %vm346_vm0, %v325_v31  ;;  %v274_v31 = vld [vmem:[%s1552_s11] sm:$0xff] }
  0x3e   : > { %1218 = vmatprep.mubr.msk.f32.mxu0 %vm346_vm0, %v326_v32  ;;  %v281_v32 = vld [vmem:[%s1552_s11 + $0x38] sm:$0xff] }
  0x41   : > { %1219 = vmatmul.mubr.msk.f32.gmra.mrb[20].mxu0 %vm346_vm0, %v327_v33  ;;  %v277_v33 = vld [vmem:[%s1552_s11 + $0x18] sm:$0xff] }
  0x42   : > { %1221 = vmatprep.mubr.msk.f32.mxu0 %vm346_vm0, %v328_v34  ;;  %v280_v34 = vld [vmem:[%s1552_s11 + $0x30] sm:$0xff] }
  0x45   : > { %1222 = vmatmul.mubr.msk.f32.gmra.mrb[22].mxu0 %vm346_vm0, %v329_v35  ;;  %v276_v35 = vld [vmem:[%s1552_s11 + $0x10] sm:$0xff] }
  0x46   : > { %1224 = vmatprep.mubr.msk.f32.mxu0 %vm346_vm0, %v330_v36  ;;  %v283_v36 = vld [vmem:[%s1552_s11 + $0x48] sm:$0xff] }
  0x49   : > { %1225 = vmatmul.mubr.msk.f32.gmra.mrb[24].mxu0 %vm346_vm0, %v331_v37  ;;  %v282_v37 = vld [vmem:[%s1552_s11 + $0x40] sm:$0xff] }
  0x4a   : > { %1227 = vmatprep.mubr.msk.f32.mxu0 %vm346_vm0, %v332_v38  ;;  %v285_v38 = vld [vmem:[%s1552_s11 + $0x58] sm:$0xff] }
  0x4d   : > { %1228 = vmatmul.mubr.msk.f32.gmra.mrb[26].mxu0 %vm346_vm0, %v333_v39  ;;  %v284_v39 = vld [vmem:[%s1552_s11 + $0x50] sm:$0xff] }
  0x4e   : > { %1230 = vmatprep.mubr.msk.f32.mxu0 %vm346_vm0, %v334_v40  ;;  %v287_v40 = vld [vmem:[%s1552_s11 + $0x68] sm:$0xff] }
  0x51   : > { %1231 = vmatmul.mubr.msk.f32.gmra.mrb[28].mxu0 %vm346_vm0, %v335_v41  ;;  %v286_v41 = vld [vmem:[%s1552_s11 + $0x60] sm:$0xff] }
  0x52   : > { %1233 = vmatprep.mubr.msk.f32.mxu0 %vm346_vm0, %v336_v42  ;;  %v289_v42 = vld [vmem:[%s1552_s11 + $0x78] sm:$0xff] }
  0x55   : > { %1234 = vmatmul.mubr.msk.f32.gmra.mrb[30].mxu0 %vm346_vm0, %v337_v43  ;;  %v288_v43 = vld [vmem:[%s1552_s11 + $0x70] sm:$0xff] }
  0x56   : > { %748 = vmatprep.mubr.f32.mxu0 %v275_v45  ;;  %v290_v45 = vld [vmem:[%s1552_s11 + $0x80] sm:$0xff] }
  0xec   : > { %v1190_v46 = vpop.f32.mrb[0].mxu0 }
  0xed   : > { %v509_v47 = vpop.f32.mrb[1].mxu0 }
  0xee   : > { %v1254_v48 = vpack.c.bf16 %v1190_v46, %v509_v47  ;;  %v293_v46 = vld [vmem:[%s1552_s11 + $0x98] sm:$0xff]  ;;  %v292_v47 = vld [vmem:[%s1552_s11 + $0x90] sm:$0xff] }
  0xf0   : > { %v1193_v49 = vpop.f32.mrb[2].mxu0 }
  0xf1   : > { %v519_v50 = vpop.f32.mrb[3].mxu0 }
  0xf2   : > { %v1258_v51 = vpack.c.bf16 %v1193_v49, %v519_v50  ;;  %v294_v49 = vld [vmem:[%s1552_s11 + $0xa0] sm:$0xff]  ;;  %v297_v50 = vld [vmem:[%s1552_s11 + $0xb8] sm:$0xff] }
  0xf4   : > { %v1196_v52 = vpop.f32.mrb[4].mxu0 }
  0xf5   : > { %v529_v53 = vpop.f32.mrb[5].mxu0 }
  0xf6   : > { %v1262_v54 = vpack.c.bf16 %v1196_v52, %v529_v53  ;;  %v299_v52 = vld [vmem:[%s1552_s11 + $0xc8] sm:$0xff]  ;;  %v298_v53 = vld [vmem:[%s1552_s11 + $0xc0] sm:$0xff] }
  0xf8   : > { %v1199_v55 = vpop.f32.mrb[6].mxu0 }
  0xf9   : > { %v539_v56 = vpop.f32.mrb[7].mxu0 }
  0xfa   : > { %v1266_v57 = vpack.c.bf16 %v1199_v55, %v539_v56  ;;  %v300_v55 = vld [vmem:[%s1552_s11 + $0xd0] sm:$0xff]  ;;  %v303_v56 = vld [vmem:[%s1552_s11 + $0xe8] sm:$0xff] }
  0xfc   : > { %v1202_v58 = vpop.f32.mrb[8].mxu0 }
  0xfd   : > { %v549_v59 = vpop.f32.mrb[9].mxu0 }
  0xfe   : > { %v1270_v60 = vpack.c.bf16 %v1202_v58, %v549_v59  ;;  %v305_v58 = vld [vmem:[%s1552_s11 + $0xf8] sm:$0xff]  ;;  %v304_v59 = vld [vmem:[%s1552_s11 + $0xf0] sm:$0xff] }
 0x100   : > { %v1205_v61 = vpop.f32.mrb[10].mxu0 }
 0x101   : > { %v559_v62 = vpop.f32.mrb[11].mxu0 }
 0x102   : > { %v1274_v63 = vpack.c.bf16 %v1205_v61, %v559_v62 }
 0x104   : > { %v1208_v0 = vpop.f32.mrb[12].mxu0 }
 0x105   : > { %v569_v1 = vpop.f32.mrb[13].mxu0 }
 0x106   : > { %v1278_v2 = vpack.c.bf16 %v1208_v0, %v569_v1 }
 0x108   : > { %v1211_v3 = vpop.f32.mrb[14].mxu0 }
 0x109   : > { %v579_v4 = vpop.f32.mrb[15].mxu0 }
 0x10a   : > { %v1282_v5 = vpack.c.bf16 %v1211_v3, %v579_v4 }
 0x10c   : > { %v1214_v6 = vpop.f32.mrb[16].mxu0 }
 0x10d   : > { %v589_v7 = vpop.f32.mrb[17].mxu0 }
 0x10e   : > { %v1252_v8 = vpack.c.bf16 %v1214_v6, %v589_v7 }
 0x110   : > { %v1217_v9 = vpop.f32.mrb[18].mxu0  ;;  %1253 = vmatprep.subr.bf16.mxu0 %v1252_v8  ;;  %1284 = vmatprep.subr.bf16.mxu1 %v1252_v8 }
 0x111   : > { %v599_v10 = vpop.f32.mrb[19].mxu0  ;;  %1255 = vmatpush3.bf16.msra.mxu0 %v1254_v48  ;;  %1292 = vmatpush3.bf16.msra.mxu1 %v1254_v48  ;;  %v295_v48 = vld [vmem:[%s1552_s11 + $0xa8] sm:$0xff] }
 0x112   : > { %v1256_v11 = vpack.c.bf16 %v1217_v9, %v599_v10 }
 0x114   : > { %v1220_v12 = vpop.f32.mrb[20].mxu0  ;;  %1257 = vmatprep.subr.bf16.mxu0 %v1256_v11  ;;  %1285 = vmatprep.subr.bf16.mxu1 %v1256_v11 }
 0x115   : > { %v609_v13 = vpop.f32.mrb[21].mxu0  ;;  %1259 = vmatpush3.bf16.msra.mxu0 %v1258_v51  ;;  %1293 = vmatpush3.bf16.msra.mxu1 %v1258_v51  ;;  %v296_v51 = vld [vmem:[%s1552_s11 + $0xb0] sm:$0xff] }
 0x116   : > { %v1260_v14 = vpack.c.bf16 %v1220_v12, %v609_v13 }
 0x118   : > { %v1223_v15 = vpop.f32.mrb[22].mxu0  ;;  %1261 = vmatprep.subr.bf16.mxu0 %v1260_v14  ;;  %1286 = vmatprep.subr.bf16.mxu1 %v1260_v14 }
 0x119   : > { %v619_v16 = vpop.f32.mrb[23].mxu0  ;;  %1263 = vmatpush3.bf16.msra.mxu0 %v1262_v54  ;;  %1294 = vmatpush3.bf16.msra.mxu1 %v1262_v54  ;;  %v301_v54 = vld [vmem:[%s1552_s11 + $0xd8] sm:$0xff] }
 0x11a   : > { %v1264_v17 = vpack.c.bf16 %v1223_v15, %v619_v16 }
 0x11c   : > { %v1226_v18 = vpop.f32.mrb[24].mxu0  ;;  %1265 = vmatprep.subr.bf16.mxu0 %v1264_v17  ;;  %1287 = vmatprep.subr.bf16.mxu1 %v1264_v17 }
 0x11d   : > { %v629_v19 = vpop.f32.mrb[25].mxu0  ;;  %1267 = vmatpush3.bf16.msra.mxu0 %v1266_v57  ;;  %1295 = vmatpush3.bf16.msra.mxu1 %v1266_v57  ;;  %v302_v57 = vld [vmem:[%s1552_s11 + $0xe0] sm:$0xff] }
 0x11e   : > { %v1268_v20 = vpack.c.bf16 %v1226_v18, %v629_v19 }
 0x120   : > { %v1229_v21 = vpop.f32.mrb[26].mxu0  ;;  %1269 = vmatprep.subr.bf16.mxu0 %v1268_v20  ;;  %1288 = vmatprep.subr.bf16.mxu1 %v1268_v20 }
 0x121   : > { %v639_v22 = vpop.f32.mrb[27].mxu0  ;;  %1271 = vmatpush3.bf16.msra.mxu0 %v1270_v60  ;;  %1296 = vmatpush3.bf16.msra.mxu1 %v1270_v60 }
 0x122   : > { %v1272_v23 = vpack.c.bf16 %v1229_v21, %v639_v22 }
 0x124   : > { %v1232_v24 = vpop.f32.mrb[28].mxu0  ;;  %1273 = vmatprep.subr.bf16.mxu0 %v1272_v23  ;;  %1289 = vmatprep.subr.bf16.mxu1 %v1272_v23 }
 0x125   : > { %v649_v25 = vpop.f32.mrb[29].mxu0  ;;  %1275 = vmatpush3.bf16.msra.mxu0 %v1274_v63  ;;  %1297 = vmatpush3.bf16.msra.mxu1 %v1274_v63  ;;  %v1590_v63 = vld [vmem:[%s1641_s3] ss:$0 sm:$0xff] }
 0x126   : > { %v1276_v26 = vpack.c.bf16 %v1232_v24, %v649_v25 }
 0x128   : > { %v1235_v27 = vpop.f32.mrb[30].mxu0  ;;  %1277 = vmatprep.subr.bf16.mxu0 %v1276_v26  ;;  %1290 = vmatprep.subr.bf16.mxu1 %v1276_v26 }
 0x129   : > { %v659_v28 = vpop.f32.mrb[31].mxu0  ;;  %1279 = vmatpush3.bf16.msra.mxu0 %v1278_v2  ;;  %1298 = vmatpush3.bf16.msra.mxu1 %v1278_v2 }
 0x12a   : > { %v1280_v29 = vpack.c.bf16 %v1235_v27, %v659_v28 }
 0x12c   : > { %1281 = vmatprep.subr.bf16.mxu0 %v1280_v29  ;;  %1291 = vmatprep.subr.bf16.mxu1 %v1280_v29 }
 0x12d   : > { %1283 = vmatpush3.bf16.msra.mxu0 %v1282_v5  ;;  %1299 = vmatpush3.bf16.msra.mxu1 %v1282_v5 }
 0x130   : > { %759 = vmatmul.mubr.f32.vlgmr.msra.gmra.mrb[0].mxu1 %v278_v30  ;;  %749 = vmatmul.mubr.f32.vlgmr.msra.gmra.mrb[32].mxu0 %v274_v31 }
 0x131   : > { %763 = vmatprep.mubr.f32.mxu1 %v281_v32  ;;  %753 = vmatprep.mubr.f32.mxu0 %v277_v33 }
 0x134   : > { %764 = vmatmul.mubr.f32.gmra.mrb[2].mxu1 %v280_v34  ;;  %754 = vmatmul.mubr.f32.gmra.mrb[34].mxu0 %v276_v35 }
 0x135   : > { %768 = vmatprep.mubr.f32.mxu1 %v283_v36 }
 0x138   : > { %769 = vmatmul.mubr.f32.gmra.mrb[4].mxu1 %v282_v37 }
 0x139   : > { %773 = vmatprep.mubr.f32.mxu1 %v285_v38 }
 0x13c   : > { %774 = vmatmul.mubr.f32.gmra.mrb[6].mxu1 %v284_v39 }
 0x13d   : > { %778 = vmatprep.mubr.f32.mxu1 %v287_v40 }
 0x140   : > { %779 = vmatmul.mubr.f32.gmra.mrb[8].mxu1 %v286_v41 }
 0x141   : > { %783 = vmatprep.mubr.f32.mxu1 %v289_v42 }
 0x144   : > { %784 = vmatmul.mubr.f32.gmra.mrb[10].mxu1 %v288_v43 }
 0x145   : > { %788 = vmatprep.mubr.f32.mxu1 %v291_v44 }
 0x148   : > { %789 = vmatmul.mubr.f32.gmra.mrb[12].mxu1 %v290_v45 }
 0x149   : > { %793 = vmatprep.mubr.f32.mxu1 %v293_v46 }
 0x14c   : > { %794 = vmatmul.mubr.f32.gmra.mrb[14].mxu1 %v292_v47 }
 0x14d   : > { %798 = vmatprep.mubr.f32.mxu1 %v295_v48 }
 0x150   : > { %799 = vmatmul.mubr.f32.gmra.mrb[16].mxu1 %v294_v49 }
 0x151   : > { %803 = vmatprep.mubr.f32.mxu1 %v297_v50 }
 0x154   : > { %804 = vmatmul.mubr.f32.gmra.mrb[18].mxu1 %v296_v51 }
 0x155   : > { %808 = vmatprep.mubr.f32.mxu1 %v299_v52 }
 0x158   : > { %809 = vmatmul.mubr.f32.gmra.mrb[20].mxu1 %v298_v53 }
 0x159   : > { %813 = vmatprep.mubr.f32.mxu1 %v301_v54 }
 0x15c   : > { %814 = vmatmul.mubr.f32.gmra.mrb[22].mxu1 %v300_v55 }
 0x15d   : > { %818 = vmatprep.mubr.f32.mxu1 %v303_v56 }
 0x160   : > { %819 = vmatmul.mubr.f32.gmra.mrb[24].mxu1 %v302_v57 }
 0x161   : > { %823 = vmatprep.mubr.f32.mxu1 %v305_v58 }
 0x164   : > { %824 = vmatmul.mubr.f32.gmra.mrb[26].mxu1 %v304_v59 }
 0x203   : > { %v1130_v60 = vpop.f32.mrb[0].mxu1  ;;  %v1124_v61 = vpop.f32.mrb[32].mxu0 }
 0x204   : > { %v1131_v62 = vpop.f32.mrb[1].mxu1  ;;  %v1125_v0 = vpop.f32.mrb[33].mxu0 }
 0x205   : > { %v1132_v1 = vadd.f32 %v1131_v62, %v1130_v60  ;;  %v1126_v2 = vadd.f32 %v1125_v0, %v1124_v61 }
 0x207   : > { %v889_v3 = vadd.f32 %v1132_v1, %v1590_v63  ;;  %v1133_v4 = vpop.f32.mrb[2].mxu1  ;;  %v887_v5 = vadd.f32 %v1126_v2, %v1590_v63  ;;  %v1127_v6 = vpop.f32.mrb[34].mxu0 }
 0x208   : > { %v1134_v7 = vpop.f32.mrb[3].mxu1  ;;  %v1128_v8 = vpop.f32.mrb[35].mxu0 }
 0x209   : > { %905 = vst [vmem:[%s1595_s20 + $0x10] sm:$0xff] %v889_v3  ;;  %v1135_v9 = vadd.f32 %v1134_v7, %v1133_v4  ;;  %903 = vst [vmem:[%s1595_s20] sm:$0xff] %v887_v5  ;;  %v1129_v10 = vadd.f32 %v1128_v8, %v1127_v6 }
 0x20b   : > { %v890_v11 = vadd.f32 %v1135_v9, %v1590_v63  ;;  %v1136_v12 = vpop.f32.mrb[4].mxu1  ;;  %v888_v13 = vadd.f32 %v1129_v10, %v1590_v63 }
 0x20c   : > { %v1137_v14 = vpop.f32.mrb[5].mxu1 }
 0x20d   : > { %906 = vst [vmem:[%s1595_s20 + $0x18] sm:$0xff] %v890_v11  ;;  %v1138_v15 = vadd.f32 %v1137_v14, %v1136_v12  ;;  %904 = vst [vmem:[%s1595_s20 + $0x8] sm:$0xff] %v888_v13 }
 0x20f   : > { %v891_v16 = vadd.f32 %v1138_v15, %v1590_v63  ;;  %v1139_v17 = vpop.f32.mrb[6].mxu1 }
 0x210   : > { %v1140_v18 = vpop.f32.mrb[7].mxu1 }
 0x211   : > { %907 = vst [vmem:[%s1595_s20 + $0x20] sm:$0xff] %v891_v16  ;;  %v1141_v19 = vadd.f32 %v1140_v18, %v1139_v17 }
 0x213   : > { %v892_v20 = vadd.f32 %v1141_v19, %v1590_v63  ;;  %v1142_v21 = vpop.f32.mrb[8].mxu1 }
 0x214   : > { %v1143_v22 = vpop.f32.mrb[9].mxu1 }
 0x215   : > { %908 = vst [vmem:[%s1595_s20 + $0x28] sm:$0xff] %v892_v20  ;;  %v1144_v23 = vadd.f32 %v1143_v22, %v1142_v21 }
 0x217   : > { %v893_v24 = vadd.f32 %v1144_v23, %v1590_v63  ;;  %v1145_v25 = vpop.f32.mrb[10].mxu1 }
 0x218   : > { %v1146_v26 = vpop.f32.mrb[11].mxu1 }
 0x219   : > { %909 = vst [vmem:[%s1595_s20 + $0x30] sm:$0xff] %v893_v24  ;;  %v1147_v27 = vadd.f32 %v1146_v26, %v1145_v25 }
 0x21b   : > { %v894_v28 = vadd.f32 %v1147_v27, %v1590_v63  ;;  %v1148_v29 = vpop.f32.mrb[12].mxu1 }
 0x21c   : > { %v1149_v30 = vpop.f32.mrb[13].mxu1 }
 0x21d   : > { %910 = vst [vmem:[%s1595_s20 + $0x38] sm:$0xff] %v894_v28  ;;  %v1150_v31 = vadd.f32 %v1149_v30, %v1148_v29 }
 0x21f   : > { %v895_v32 = vadd.f32 %v1150_v31, %v1590_v63  ;;  %v1151_v33 = vpop.f32.mrb[14].mxu1 }
 0x220   : > { %v1152_v34 = vpop.f32.mrb[15].mxu1 }
 0x221   : > { %911 = vst [vmem:[%s1595_s20 + $0x40] sm:$0xff] %v895_v32  ;;  %v1153_v35 = vadd.f32 %v1152_v34, %v1151_v33 }
 0x223   : > { %v896_v36 = vadd.f32 %v1153_v35, %v1590_v63  ;;  %v1154_v37 = vpop.f32.mrb[16].mxu1 }
 0x224   : > { %v1155_v38 = vpop.f32.mrb[17].mxu1 }
 0x225   : > { %912 = vst [vmem:[%s1595_s20 + $0x48] sm:$0xff] %v896_v36  ;;  %v1156_v39 = vadd.f32 %v1155_v38, %v1154_v37 }
 0x227   : > { %v897_v40 = vadd.f32 %v1156_v39, %v1590_v63  ;;  %v1157_v41 = vpop.f32.mrb[18].mxu1 }
 0x228   : > { %v1158_v42 = vpop.f32.mrb[19].mxu1 }
 0x229   : > { %913 = vst [vmem:[%s1595_s20 + $0x50] sm:$0xff] %v897_v40  ;;  %v1159_v43 = vadd.f32 %v1158_v42, %v1157_v41 }
 0x22b   : > { %v898_v44 = vadd.f32 %v1159_v43, %v1590_v63  ;;  %v1160_v45 = vpop.f32.mrb[20].mxu1 }
 0x22c   : > { %v1161_v46 = vpop.f32.mrb[21].mxu1 }
 0x22d   : > { %914 = vst [vmem:[%s1595_s20 + $0x58] sm:$0xff] %v898_v44  ;;  %v1162_v47 = vadd.f32 %v1161_v46, %v1160_v45 }
 0x22f   : > { %v899_v48 = vadd.f32 %v1162_v47, %v1590_v63  ;;  %v1163_v49 = vpop.f32.mrb[22].mxu1 }
 0x230   : > { %v1164_v50 = vpop.f32.mrb[23].mxu1 }
 0x231   : > { %915 = vst [vmem:[%s1595_s20 + $0x60] sm:$0xff] %v899_v48  ;;  %v1165_v51 = vadd.f32 %v1164_v50, %v1163_v49 }
 0x233   : > { %v900_v52 = vadd.f32 %v1165_v51, %v1590_v63  ;;  %v1166_v53 = vpop.f32.mrb[24].mxu1 }
 0x234   : > { %v1167_v54 = vpop.f32.mrb[25].mxu1 }
 0x235   : > { %916 = vst [vmem:[%s1595_s20 + $0x68] sm:$0xff] %v900_v52  ;;  %v1168_v55 = vadd.f32 %v1167_v54, %v1166_v53 }
 0x237   : > { %v901_v56 = vadd.f32 %v1168_v55, %v1590_v63  ;;  %v1169_v57 = vpop.f32.mrb[26].mxu1 }
 0x238   : > { %v1170_v58 = vpop.f32.mrb[27].mxu1 }
 0x239   : > { %917 = vst [vmem:[%s1595_s20 + $0x70] sm:$0xff] %v901_v56  ;;  %v1171_v59 = vadd.f32 %v1170_v58, %v1169_v57 }
 0x23b   : > { %v902_v60 = vadd.f32 %v1171_v59, %v1590_v63 }
 0x23d   : > { %918 = vst [vmem:[%s1595_s20 + $0x78] sm:$0xff] %v902_v60 }
 0x23e PF: > { %s14_s17 = sadd.s32 1, %s1346_s17   ;;  %s1643_s15 = smov %s1342_s16 }
 0x23f   : > { %p11_p5 = scmp.ge.s32.totalorder %s14_s17, 4   ;;  %s1644_s16 = smov %s1646_s18 }
 0x241   :  { %13 = sbr.rel (!%p11_p5) target bundleno = 2 (0x2), region = 77 }

</bundles_post_ra>
